<compile_context>
chip_gen: v6e
topology: v6e:2x2x1
jax: 0.10.0
libtpu: 0.0.40
codegen_flags: <defaults>
</compile_context>

<pallas_src>
import math
from functools import partial

import jax
import jax.numpy as jnp
from jax import lax
from jax.experimental import pallas as pl
from jax.experimental.pallas import tpu as pltpu


def _tile(dim, target, base):
    """Largest block <= target that divides dim and is a multiple of base,
    else the full dim (full-extent blocks always satisfy TPU tiling)."""
    if dim <= target:
        return dim
    t = (target // base) * base
    while t >= base:
        if dim % t == 0:
            return t
        t -= base
    return dim


def _gelu(x):
    # GPT-2 GELU (tanh approximation).
    return 0.5 * x * (1.0 + jnp.tanh(0.7978845608028654 * (x + 0.044715 * x * x * x)))


# --------------------------------------------------------------------------
# LayerNorm kernel
# --------------------------------------------------------------------------
def _layernorm_kernel(x_ref, g_ref, b_ref, o_ref, *, eps):
    x = x_ref[...].astype(jnp.float32)
    mu = jnp.mean(x, axis=-1, keepdims=True)
    xc = x - mu
    var = jnp.mean(xc * xc, axis=-1, keepdims=True)
    y = xc * lax.rsqrt(var + eps)
    y = y * g_ref[...].astype(jnp.float32) + b_ref[...].astype(jnp.float32)
    o_ref[...] = y.astype(o_ref.dtype)


def layernorm(x, gamma, beta, *, eps):
    m, h = x.shape
    tm = _tile(m, 512, 8)
    return pl.pallas_call(
        partial(_layernorm_kernel, eps=eps),
        out_shape=jax.ShapeDtypeStruct((m, h), x.dtype),
        grid_spec=pltpu.PrefetchScalarGridSpec(
            num_scalar_prefetch=0,
            grid=(m // tm,),
            in_specs=[
                pl.BlockSpec((tm, h), lambda i: (i, 0)),
                pl.BlockSpec((1, h), lambda i: (0, 0)),
                pl.BlockSpec((1, h), lambda i: (0, 0)),
            ],
            out_specs=pl.BlockSpec((tm, h), lambda i: (i, 0)),
        ),
        compiler_params=pltpu.CompilerParams(dimension_semantics=("parallel",)),
    )(x, gamma.reshape(1, h), beta.reshape(1, h))


# --------------------------------------------------------------------------
# Linear (matmul + fused bias / activation / residual epilogue)
# --------------------------------------------------------------------------
def _linear_kernel(*refs, activation, k_steps, has_residual):
    if has_residual:
        x_ref, w_ref, b_ref, res_ref, o_ref, acc_ref = refs
    else:
        x_ref, w_ref, b_ref, o_ref, acc_ref = refs
        res_ref = None
    k = pl.program_id(2)

    @pl.when(k == 0)
    def _():
        acc_ref[...] = jnp.zeros_like(acc_ref)

    acc_ref[...] += jnp.dot(x_ref[...], w_ref[...],
                            preferred_element_type=jnp.float32)

    @pl.when(k == k_steps - 1)
    def _():
        y = acc_ref[...] + b_ref[...].astype(jnp.float32)
        if activation == "gelu":
            y = _gelu(y)
        if res_ref is not None:
            y = y + res_ref[...].astype(jnp.float32)
        o_ref[...] = y.astype(o_ref.dtype)


def linear(x, w, b, *, activation=None, residual=None):
    m, kdim = x.shape
    _, n = w.shape
    tm = _tile(m, 256, 8)
    tn = _tile(n, 256, 128)
    tk = _tile(kdim, 512, 128)
    k_steps = kdim // tk

    in_specs = [
        pl.BlockSpec((tm, tk), lambda i, j, k: (i, k)),
        pl.BlockSpec((tk, tn), lambda i, j, k: (k, j)),
        pl.BlockSpec((1, tn), lambda i, j, k: (0, j)),
    ]
    args = [x, w, b.reshape(1, n)]
    if residual is not None:
        in_specs.append(pl.BlockSpec((tm, tn), lambda i, j, k: (i, j)))
        args.append(residual)

    return pl.pallas_call(
        partial(_linear_kernel, activation=activation, k_steps=k_steps,
                has_residual=residual is not None),
        out_shape=jax.ShapeDtypeStruct((m, n), x.dtype),
        grid_spec=pltpu.PrefetchScalarGridSpec(
            num_scalar_prefetch=0,
            grid=(m // tm, n // tn, k_steps),
            in_specs=in_specs,
            out_specs=pl.BlockSpec((tm, tn), lambda i, j, k: (i, j)),
            scratch_shapes=[pltpu.VMEM((tm, tn), jnp.float32)],
        ),
        compiler_params=pltpu.CompilerParams(
            dimension_semantics=("parallel", "parallel", "arbitrary")),
    )(*args)


# --------------------------------------------------------------------------
# Causal self-attention kernel (one (batch, head) per grid step)
# --------------------------------------------------------------------------
def _attention_kernel(q_ref, k_ref, v_ref, o_ref, *, scale):
    q = q_ref[...][0].astype(jnp.float32)      # (S, hd)
    k = k_ref[...][0].astype(jnp.float32)      # (S, hd)
    v = v_ref[...][0].astype(jnp.float32)      # (S, hd)
    s = lax.dot_general(q, k, (((1,), (1,)), ((), ())),
                        preferred_element_type=jnp.float32) * scale   # (S, S)
    seq = s.shape[0]
    row = lax.broadcasted_iota(jnp.int32, (seq, seq), 0)
    col = lax.broadcasted_iota(jnp.int32, (seq, seq), 1)
    # torch.where(causal_mask, x, -10000.0)
    s = jnp.where(row >= col, s, jnp.float32(-10000.0))
    m = jnp.max(s, axis=-1, keepdims=True)
    p = jnp.exp(s - m)
    p = p / jnp.sum(p, axis=-1, keepdims=True)
    o = jnp.dot(p, v, preferred_element_type=jnp.float32)             # (S, hd)
    o_ref[...] = o[None].astype(o_ref.dtype)


def causal_attention(q, k, v, *, scale):
    bh, s, hd = q.shape
    spec = pl.BlockSpec((1, s, hd), lambda i: (i, 0, 0))
    return pl.pallas_call(
        partial(_attention_kernel, scale=scale),
        out_shape=jax.ShapeDtypeStruct((bh, s, hd), q.dtype),
        grid_spec=pltpu.PrefetchScalarGridSpec(
            num_scalar_prefetch=0,
            grid=(bh,),
            in_specs=[spec, spec, spec],
            out_specs=spec,
        ),
        compiler_params=pltpu.CompilerParams(dimension_semantics=("parallel",)),
    )(q, k, v)


# --------------------------------------------------------------------------
# Full GPT2Block forward
# --------------------------------------------------------------------------
def gpt2_block_forward(x, params, *, num_heads, eps=1e-5,
                       apply_post_layernorm=False, attention_mask=None):
    # TODO(synk): non-None attention_mask (additive pre-softmax bias) is not
    #             plumbed into the attention kernel; only the default None
    #             path of the reference module is implemented.
    # TODO(synk): dropout / attention_dropout are identity (inference mode);
    #             torch.utils.checkpoint is a training-only construct.
    assert attention_mask is None
    B, S, H = x.shape
    hd = H // num_heads
    x2 = x.reshape(B * S, H)

    # --- attention sub-block ---
    residual = x2
    h = layernorm(x2, params["ln1_g"], params["ln1_b"], eps=eps)
    if apply_post_layernorm:
        residual = h
    qkv = linear(h, params["w_qkv"], params["b_qkv"])              # (B*S, 3H)
    # torch: view(B,S,nh,3*hd) -> permute(0,2,1,3) -> chunk(3) on last dim
    qkv = qkv.reshape(B, S, num_heads, 3, hd)
    qkv = jnp.transpose(qkv, (3, 0, 2, 1, 4))                      # (3,B,nh,S,hd)
    q = qkv[0].reshape(B * num_heads, S, hd)
    k = qkv[1].reshape(B * num_heads, S, hd)
    v = qkv[2].reshape(B * num_heads, S, hd)
    ctx = causal_attention(q, k, v, scale=1.0 / math.sqrt(hd))     # (B*nh,S,hd)
    ctx = ctx.reshape(B, num_heads, S, hd).transpose(0, 2, 1, 3).reshape(B * S, H)
    x2 = linear(ctx, params["w_proj"], params["b_proj"], residual=residual)

    # --- MLP sub-block ---
    residual = x2
    h = layernorm(x2, params["ln2_g"], params["ln2_b"], eps=eps)
    if apply_post_layernorm:
        residual = h
    h1 = linear(h, params["w_fc1"], params["b_fc1"], activation="gelu")
    x2 = linear(h1, params["w_fc2"], params["b_fc2"], residual=residual)
    return x2.reshape(B, S, H)


# --------------------------------------------------------------------------
# Pure-JAX reference (matches the PyTorch forward semantics)
# --------------------------------------------------------------------------
def _reference_block(x, p, *, num_heads, eps, apply_post_layernorm=False):
    B, S, H = x.shape
    hd = H // num_heads
    hi = lax.Precision.HIGHEST

    def ln(t, g, b):
        mu = jnp.mean(t, axis=-1, keepdims=True)
        var = jnp.mean((t - mu) ** 2, axis=-1, keepdims=True)
        return (t - mu) / jnp.sqrt(var + eps) * g + b

    residual = x
    h = ln(x, p["ln1_g"], p["ln1_b"])
    if apply_post_layernorm:
        residual = h
    qkv = jnp.dot(h, p["w_qkv"], precision=hi) + p["b_qkv"]
    qkv = qkv.reshape(B, S, num_heads, 3 * hd).transpose(0, 2, 1, 3)
    q, k, v = jnp.split(qkv, 3, axis=-1)
    s = jnp.einsum("bhqd,bhkd->bhqk", q, k, precision=hi) / math.sqrt(hd)
    mask = jnp.tril(jnp.ones((S, S), dtype=bool))
    s = jnp.where(mask[None, None], s, jnp.float32(-10000.0))
    a = jax.nn.softmax(s, axis=-1)
    ctx = jnp.einsum("bhqk,bhkd->bhqd", a, v, precision=hi)
    ctx = ctx.transpose(0, 2, 1, 3).reshape(B, S, H)
    x = residual + (jnp.dot(ctx, p["w_proj"], precision=hi) + p["b_proj"])
    residual = x
    h = ln(x, p["ln2_g"], p["ln2_b"])
    if apply_post_layernorm:
        residual = h
    h1 = _gelu(jnp.dot(h, p["w_fc1"], precision=hi) + p["b_fc1"])
    return residual + (jnp.dot(h1, p["w_fc2"], precision=hi) + p["b_fc2"])


if __name__ == "__main__":
    B, S, H, NH, I = 2, 8, 32, 4, 128  # batch=2, seq=8 (=max_positions), hidden=32
    ks = jax.random.split(jax.random.PRNGKey(0), 13)
    w = 0.05
    params = {
        "ln1_g": 1.0 + 0.1 * jax.random.normal(ks[0], (H,), jnp.float32),
        "ln1_b": 0.1 * jax.random.normal(ks[1], (H,), jnp.float32),
        "w_qkv": w * jax.random.normal(ks[2], (H, 3 * H), jnp.float32),
        "b_qkv": w * jax.random.normal(ks[3], (3 * H,), jnp.float32),
        "w_proj": w * jax.random.normal(ks[4], (H, H), jnp.float32),
        "b_proj": w * jax.random.normal(ks[5], (H,), jnp.float32),
        "ln2_g": 1.0 + 0.1 * jax.random.normal(ks[6], (H,), jnp.float32),
        "ln2_b": 0.1 * jax.random.normal(ks[7], (H,), jnp.float32),
        "w_fc1": w * jax.random.normal(ks[8], (H, I), jnp.float32),
        "b_fc1": w * jax.random.normal(ks[9], (I,), jnp.float32),
        "w_fc2": w * jax.random.normal(ks[10], (I, H), jnp.float32),
        "b_fc2": w * jax.random.normal(ks[11], (H,), jnp.float32),
    }
    x = jax.random.normal(ks[12], (B, S, H), jnp.float32)

    fwd = jax.jit(partial(gpt2_block_forward, num_heads=NH, eps=1e-5))
    out = jax.block_until_ready(fwd(x, params))
    ref = jax.block_until_ready(_reference_block(x, params, num_heads=NH, eps=1e-5))

    assert out.shape == (B, S, H)
    max_err = float(jnp.max(jnp.abs(out - ref)))
    assert jnp.allclose(out, ref, rtol=2e-3, atol=2e-3), max_err
    print("KERNEL_OK")
</pallas_src>

<mosaic_0001>
module attributes {stable_mosaic.version = 11 : i64} {
  func.func @_linear_kernel(%arg0: i32, %arg1: i32, %arg2: i32, %arg3: memref<16x32xf32, #tpu.memory_space<vmem>>, %arg4: memref<32x96xf32, #tpu.memory_space<vmem>>, %arg5: memref<1x96xf32, #tpu.memory_space<vmem>>, %arg6: memref<16x96xf32, #tpu.memory_space<vmem>>, %arg7: memref<16x96xf32, #tpu.memory_space<vmem>>) attributes {dimension_semantics = [#tpu.dimension_semantics<parallel>, #tpu.dimension_semantics<parallel>, #tpu.dimension_semantics<arbitrary>], iteration_bounds = array<i64: 1, 1, 1>, scalar_prefetch = 0 : i64, scratch_operands = 1 : i64, tpu.core_type = #tpu.core_type<tc>, window_params = [{transform_indices = @transform_0, window_bounds = array<i64: 16, 32>}, {transform_indices = @transform_1, window_bounds = array<i64: 32, 96>}, {transform_indices = @transform_2, window_bounds = array<i64: 1, 96>}, {transform_indices = @transform_3, window_bounds = array<i64: 16, 96>}]} {
    %c0_i32 = arith.constant 0 : i32
    %0 = arith.cmpi eq, %arg2, %c0_i32 : i32
    %1 = arith.extui %0 : i1 to i32
    %c0_i32_0 = arith.constant 0 : i32
    %2 = arith.cmpi ne, %1, %c0_i32_0 : i32
    scf.if %2 {
      %cst_10 = arith.constant 0.000000e+00 : f32
      %12 = vector.broadcast %cst_10 : f32 to vector<16x96xf32>
      %c0_11 = arith.constant 0 : index
      %c0_12 = arith.constant 0 : index
      %13 = vector.load %arg7[%c0_11, %c0_12] : memref<16x96xf32, #tpu.memory_space<vmem>>, vector<16x96xf32>
      tpu.vector_store %arg7[%c0_11, %c0_12], %12 {strides = array<i32>} : memref<16x96xf32, #tpu.memory_space<vmem>>, vector<16x96xf32>,
    } else {
    }
    %c0 = arith.constant 0 : index
    %c0_1 = arith.constant 0 : index
    %3 = vector.load %arg7[%c0, %c0_1] : memref<16x96xf32, #tpu.memory_space<vmem>>, vector<16x96xf32>
    %c0_2 = arith.constant 0 : index
    %c0_3 = arith.constant 0 : index
    %4 = vector.load %arg3[%c0_2, %c0_3] : memref<16x32xf32, #tpu.memory_space<vmem>>, vector<16x32xf32>
    %c0_4 = arith.constant 0 : index
    %c0_5 = arith.constant 0 : index
    %5 = vector.load %arg4[%c0_4, %c0_5] : memref<32x96xf32, #tpu.memory_space<vmem>>, vector<32x96xf32>
    %cst = arith.constant dense<0.000000e+00> : vector<16x96xf32>
    %6 = tpu.matmul %4, %5, %cst {dimension_numbers = #tpu.dot_dimension_numbers<[1], [0], [0], [1], [0, 0, 1, 1], [], []>} : vector<16x32xf32>, vector<32x96xf32>, vector<16x96xf32> -> vector<16x96xf32>
    %7 = arith.addf %3, %6 : vector<16x96xf32>
    %c0_6 = arith.constant 0 : index
    %c0_7 = arith.constant 0 : index
    %8 = vector.load %arg7[%c0_6, %c0_7] : memref<16x96xf32, #tpu.memory_space<vmem>>, vector<16x96xf32>
    tpu.vector_store %arg7[%c0_6, %c0_7], %7 {strides = array<i32>} : memref<16x96xf32, #tpu.memory_space<vmem>>, vector<16x96xf32>,
    %c0_i32_8 = arith.constant 0 : i32
    %9 = arith.cmpi eq, %arg2, %c0_i32_8 : i32
    %10 = arith.extui %9 : i1 to i32
    %c0_i32_9 = arith.constant 0 : i32
    %11 = arith.cmpi ne, %10, %c0_i32_9 : i32
    scf.if %11 {
      %c0_10 = arith.constant 0 : index
      %c0_11 = arith.constant 0 : index
      %12 = vector.load %arg7[%c0_10, %c0_11] : memref<16x96xf32, #tpu.memory_space<vmem>>, vector<16x96xf32>
      %c0_12 = arith.constant 0 : index
      %c0_13 = arith.constant 0 : index
      %13 = vector.load %arg5[%c0_12, %c0_13] : memref<1x96xf32, #tpu.memory_space<vmem>>, vector<1x96xf32>
      %14 = vector.broadcast %13 : vector<1x96xf32> to vector<16x96xf32>
      %15 = arith.addf %12, %14 : vector<16x96xf32>
      %c0_14 = arith.constant 0 : index
      %c0_15 = arith.constant 0 : index
      %16 = vector.load %arg6[%c0_14, %c0_15] : memref<16x96xf32, #tpu.memory_space<vmem>>, vector<16x96xf32>
      tpu.vector_store %arg6[%c0_14, %c0_15], %15 {strides = array<i32>} : memref<16x96xf32, #tpu.memory_space<vmem>>, vector<16x96xf32>,
    } else {
    }
    return
  }
  func.func @transform_0(%arg0: i32, %arg1: i32, %arg2: i32) -> (i32, i32) {
    %c0_i32 = arith.constant 0 : i32
    return %arg0, %arg2 : i32, i32
  }
  func.func @transform_1(%arg0: i32, %arg1: i32, %arg2: i32) -> (i32, i32) {
    %c0_i32 = arith.constant 0 : i32
    return %arg2, %arg1 : i32, i32
  }
  func.func @transform_2(%arg0: i32, %arg1: i32, %arg2: i32) -> (i32, i32) {
    %c0_i32 = arith.constant 0 : i32
    %c0_i32_0 = arith.constant 0 : i32
    return %c0_i32, %arg1 : i32, i32
  }
  func.func @transform_3(%arg0: i32, %arg1: i32, %arg2: i32) -> (i32, i32) {
    %c0_i32 = arith.constant 0 : i32
    return %arg0, %arg1 : i32, i32
  }
}

module attributes {stable_mosaic.version = 11 : i64} {
  func.func @_layernorm_kernel(%arg0: i32, %arg1: memref<16x32xf32, #tpu.memory_space<vmem>>, %arg2: memref<1x32xf32, #tpu.memory_space<vmem>>, %arg3: memref<1x32xf32, #tpu.memory_space<vmem>>, %arg4: memref<16x32xf32, #tpu.memory_space<vmem>>) attributes {dimension_semantics = [#tpu.dimension_semantics<parallel>], iteration_bounds = array<i64: 1>, scalar_prefetch = 0 : i64, scratch_operands = 0 : i64, tpu.core_type = #tpu.core_type<tc>, window_params = [{transform_indices = @transform_0, window_bounds = array<i64: 16, 32>}, {pipeline_mode = #tpu.pipeline_mode<synchronous>, transform_indices = @transform_1, window_bounds = array<i64: 1, 32>}, {pipeline_mode = #tpu.pipeline_mode<synchronous>, transform_indices = @transform_2, window_bounds = array<i64: 1, 32>}, {transform_indices = @transform_3, window_bounds = array<i64: 16, 32>}]} {
    %c0 = arith.constant 0 : index
    %c0_0 = arith.constant 0 : index
    %0 = vector.load %arg1[%c0, %c0_0] : memref<16x32xf32, #tpu.memory_space<vmem>>, vector<16x32xf32>
    %cst = arith.constant dense<0.000000e+00> : vector<16xf32>
    %1 = vector.multi_reduction <add>, %0, %cst [1] : vector<16x32xf32> to vector<16xf32>
    %2 = vector.shape_cast %1 : vector<16xf32> to vector<16x1xf32>
    %cst_1 = arith.constant 3.200000e+01 : f32
    %3 = vector.broadcast %cst_1 : f32 to vector<16x1xf32>
    %4 = arith.divf %2, %3 : vector<16x1xf32>
    %5 = vector.broadcast %4 : vector<16x1xf32> to vector<16x32xf32>
    %6 = arith.subf %0, %5 : vector<16x32xf32>
    %7 = arith.mulf %6, %6 : vector<16x32xf32>
    %cst_2 = arith.constant dense<0.000000e+00> : vector<16xf32>
    %8 = vector.multi_reduction <add>, %7, %cst_2 [1] : vector<16x32xf32> to vector<16xf32>
    %9 = vector.shape_cast %8 : vector<16xf32> to vector<16x1xf32>
    %cst_3 = arith.constant 3.200000e+01 : f32
    %10 = vector.broadcast %cst_3 : f32 to vector<16x1xf32>
    %11 = arith.divf %9, %10 : vector<16x1xf32>
    %cst_4 = arith.constant 9.99999974E-6 : f32
    %12 = vector.broadcast %cst_4 : f32 to vector<16x1xf32>
    %13 = arith.addf %11, %12 : vector<16x1xf32>
    %14 = math.rsqrt %13 : vector<16x1xf32>
    %15 = vector.broadcast %14 : vector<16x1xf32> to vector<16x32xf32>
    %16 = arith.mulf %6, %15 : vector<16x32xf32>
    %c0_5 = arith.constant 0 : index
    %c0_6 = arith.constant 0 : index
    %17 = vector.load %arg2[%c0_5, %c0_6] : memref<1x32xf32, #tpu.memory_space<vmem>>, vector<1x32xf32>
    %18 = vector.broadcast %17 : vector<1x32xf32> to vector<16x32xf32>
    %19 = arith.mulf %16, %18 : vector<16x32xf32>
    %c0_7 = arith.constant 0 : index
    %c0_8 = arith.constant 0 : index
    %20 = vector.load %arg3[%c0_7, %c0_8] : memref<1x32xf32, #tpu.memory_space<vmem>>, vector<1x32xf32>
    %21 = vector.broadcast %20 : vector<1x32xf32> to vector<16x32xf32>
    %22 = arith.addf %19, %21 : vector<16x32xf32>
    %c0_9 = arith.constant 0 : index
    %c0_10 = arith.constant 0 : index
    %23 = vector.load %arg4[%c0_9, %c0_10] : memref<16x32xf32, #tpu.memory_space<vmem>>, vector<16x32xf32>
    tpu.vector_store %arg4[%c0_9, %c0_10], %22 {strides = array<i32>} : memref<16x32xf32, #tpu.memory_space<vmem>>, vector<16x32xf32>,
    return
  }
  func.func @transform_0(%arg0: i32) -> (i32, i32) {
    %c0_i32 = arith.constant 0 : i32
    %c0_i32_0 = arith.constant 0 : i32
    return %arg0, %c0_i32 : i32, i32
  }
  func.func @transform_1(%arg0: i32) -> (i32, i32) {
    %c0_i32 = arith.constant 0 : i32
    %c0_i32_0 = arith.constant 0 : i32
    %c0_i32_1 = arith.constant 0 : i32
    return %c0_i32, %c0_i32_0 : i32, i32
  }
  func.func @transform_2(%arg0: i32) -> (i32, i32) {
    %c0_i32 = arith.constant 0 : i32
    %c0_i32_0 = arith.constant 0 : i32
    %c0_i32_1 = arith.constant 0 : i32
    return %c0_i32, %c0_i32_0 : i32, i32
  }
  func.func @transform_3(%arg0: i32) -> (i32, i32) {
    %c0_i32 = arith.constant 0 : i32
    %c0_i32_0 = arith.constant 0 : i32
    return %arg0, %c0_i32 : i32, i32
  }
}

module attributes {stable_mosaic.version = 11 : i64} {
  func.func @_attention_kernel(%arg0: i32, %arg1: memref<1x8x8xf32, #tpu.memory_space<vmem>>, %arg2: memref<1x8x8xf32, #tpu.memory_space<vmem>>, %arg3: memref<1x8x8xf32, #tpu.memory_space<vmem>>, %arg4: memref<1x8x8xf32, #tpu.memory_space<vmem>>) attributes {dimension_semantics = [#tpu.dimension_semantics<parallel>], iteration_bounds = array<i64: 8>, scalar_prefetch = 0 : i64, scratch_operands = 0 : i64, tpu.core_type = #tpu.core_type<tc>, window_params = [{transform_indices = @transform_0, window_bounds = array<i64: 1, 8, 8>}, {transform_indices = @transform_1, window_bounds = array<i64: 1, 8, 8>}, {transform_indices = @transform_2, window_bounds = array<i64: 1, 8, 8>}, {transform_indices = @transform_3, window_bounds = array<i64: 1, 8, 8>}]} {
    %c0 = arith.constant 0 : index
    %c0_0 = arith.constant 0 : index
    %c0_1 = arith.constant 0 : index
    %0 = vector.load %arg1[%c0, %c0_0, %c0_1] : memref<1x8x8xf32, #tpu.memory_space<vmem>>, vector<1x8x8xf32>
    %1 = vector.shape_cast %0 : vector<1x8x8xf32> to vector<8x8xf32>
    %c0_2 = arith.constant 0 : index
    %c0_3 = arith.constant 0 : index
    %c0_4 = arith.constant 0 : index
    %2 = vector.load %arg2[%c0_2, %c0_3, %c0_4] : memref<1x8x8xf32, #tpu.memory_space<vmem>>, vector<1x8x8xf32>
    %3 = vector.shape_cast %2 : vector<1x8x8xf32> to vector<8x8xf32>
    %c0_5 = arith.constant 0 : index
    %c0_6 = arith.constant 0 : index
    %c0_7 = arith.constant 0 : index
    %4 = vector.load %arg3[%c0_5, %c0_6, %c0_7] : memref<1x8x8xf32, #tpu.memory_space<vmem>>, vector<1x8x8xf32>
    %5 = vector.shape_cast %4 : vector<1x8x8xf32> to vector<8x8xf32>
    %cst = arith.constant dense<0.000000e+00> : vector<8x8xf32>
    %6 = tpu.matmul %1, %3, %cst {dimension_numbers = #tpu.dot_dimension_numbers<[1], [1], [0], [0], [0, 0, 1, 0], [], []>} : vector<8x8xf32>, vector<8x8xf32>, vector<8x8xf32> -> vector<8x8xf32>
    %cst_8 = arith.constant 0.353553385 : f32
    %7 = vector.broadcast %cst_8 : f32 to vector<8x8xf32>
    %8 = arith.mulf %6, %7 : vector<8x8xf32>
    %9 = tpu.iota {dimensions = array<i32: 0>} : vector<8x8xi32>
    %10 = tpu.iota {dimensions = array<i32: 1>} : vector<8x8xi32>
    %11 = arith.cmpi sge, %9, %10 : vector<8x8xi32>
    %cst_9 = arith.constant -1.000000e+04 : f32
    %12 = vector.broadcast %cst_9 : f32 to vector<8x8xf32>
    %13 = arith.select %11, %8, %12 : vector<8x8xi1>, vector<8x8xf32>
    %cst_10 = arith.constant dense<0xFF800000> : vector<8xf32>
    %14 = vector.multi_reduction <maximumf>, %13, %cst_10 [1] : vector<8x8xf32> to vector<8xf32>
    %15 = vector.shape_cast %14 : vector<8xf32> to vector<8x1xf32>
    %16 = vector.broadcast %15 : vector<8x1xf32> to vector<8x8xf32>
    %17 = arith.subf %13, %16 : vector<8x8xf32>
    %18 = math.exp %17 : vector<8x8xf32>
    %cst_11 = arith.constant dense<0.000000e+00> : vector<8xf32>
    %19 = vector.multi_reduction <add>, %18, %cst_11 [1] : vector<8x8xf32> to vector<8xf32>
    %20 = vector.shape_cast %19 : vector<8xf32> to vector<8x1xf32>
    %21 = vector.broadcast %20 : vector<8x1xf32> to vector<8x8xf32>
    %22 = arith.divf %18, %21 : vector<8x8xf32>
    %cst_12 = arith.constant dense<0.000000e+00> : vector<8x8xf32>
    %23 = tpu.matmul %22, %5, %cst_12 {dimension_numbers = #tpu.dot_dimension_numbers<[1], [0], [0], [1], [0, 0, 1, 1], [], []>} : vector<8x8xf32>, vector<8x8xf32>, vector<8x8xf32> -> vector<8x8xf32>
    %24 = vector.shape_cast %23 : vector<8x8xf32> to vector<1x8x8xf32>
    %c0_13 = arith.constant 0 : index
    %c0_14 = arith.constant 0 : index
    %c0_15 = arith.constant 0 : index
    %25 = vector.load %arg4[%c0_13, %c0_14, %c0_15] : memref<1x8x8xf32, #tpu.memory_space<vmem>>, vector<1x8x8xf32>
    tpu.vector_store %arg4[%c0_13, %c0_14, %c0_15], %24 {strides = array<i32>} : memref<1x8x8xf32, #tpu.memory_space<vmem>>, vector<1x8x8xf32>,
    return
  }
  func.func @transform_0(%arg0: i32) -> (i32, i32, i32) {
    %c0_i32 = arith.constant 0 : i32
    %c0_i32_0 = arith.constant 0 : i32
    %c0_i32_1 = arith.constant 0 : i32
    return %arg0, %c0_i32, %c0_i32_0 : i32, i32, i32
  }
  func.func @transform_1(%arg0: i32) -> (i32, i32, i32) {
    %c0_i32 = arith.constant 0 : i32
    %c0_i32_0 = arith.constant 0 : i32
    %c0_i32_1 = arith.constant 0 : i32
    return %arg0, %c0_i32, %c0_i32_0 : i32, i32, i32
  }
  func.func @transform_2(%arg0: i32) -> (i32, i32, i32) {
    %c0_i32 = arith.constant 0 : i32
    %c0_i32_0 = arith.constant 0 : i32
    %c0_i32_1 = arith.constant 0 : i32
    return %arg0, %c0_i32, %c0_i32_0 : i32, i32, i32
  }
  func.func @transform_3(%arg0: i32) -> (i32, i32, i32) {
    %c0_i32 = arith.constant 0 : i32
    %c0_i32_0 = arith.constant 0 : i32
    %c0_i32_1 = arith.constant 0 : i32
    return %arg0, %c0_i32, %c0_i32_0 : i32, i32, i32
  }
}

module attributes {stable_mosaic.version = 11 : i64} {
  func.func @_linear_kernel(%arg0: i32, %arg1: i32, %arg2: i32, %arg3: memref<16x32xf32, #tpu.memory_space<vmem>>, %arg4: memref<32x128xf32, #tpu.memory_space<vmem>>, %arg5: memref<1x128xf32, #tpu.memory_space<vmem>>, %arg6: memref<16x128xf32, #tpu.memory_space<vmem>>, %arg7: memref<16x128xf32, #tpu.memory_space<vmem>>) attributes {dimension_semantics = [#tpu.dimension_semantics<parallel>, #tpu.dimension_semantics<parallel>, #tpu.dimension_semantics<arbitrary>], iteration_bounds = array<i64: 1, 1, 1>, scalar_prefetch = 0 : i64, scratch_operands = 1 : i64, tpu.core_type = #tpu.core_type<tc>, window_params = [{transform_indices = @transform_0, window_bounds = array<i64: 16, 32>}, {transform_indices = @transform_1, window_bounds = array<i64: 32, 128>}, {transform_indices = @transform_2, window_bounds = array<i64: 1, 128>}, {transform_indices = @transform_3, window_bounds = array<i64: 16, 128>}]} {
    %c0_i32 = arith.constant 0 : i32
    %0 = arith.cmpi eq, %arg2, %c0_i32 : i32
    %1 = arith.extui %0 : i1 to i32
    %c0_i32_0 = arith.constant 0 : i32
    %2 = arith.cmpi ne, %1, %c0_i32_0 : i32
    scf.if %2 {
      %cst_10 = arith.constant 0.000000e+00 : f32
      %12 = vector.broadcast %cst_10 : f32 to vector<16x128xf32>
      %c0_11 = arith.constant 0 : index
      %c0_12 = arith.constant 0 : index
      %13 = vector.load %arg7[%c0_11, %c0_12] : memref<16x128xf32, #tpu.memory_space<vmem>>, vector<16x128xf32>
      tpu.vector_store %arg7[%c0_11, %c0_12], %12 {strides = array<i32>} : memref<16x128xf32, #tpu.memory_space<vmem>>, vector<16x128xf32>,
    } else {
    }
    %c0 = arith.constant 0 : index
    %c0_1 = arith.constant 0 : index
    %3 = vector.load %arg7[%c0, %c0_1] : memref<16x128xf32, #tpu.memory_space<vmem>>, vector<16x128xf32>
    %c0_2 = arith.constant 0 : index
    %c0_3 = arith.constant 0 : index
    %4 = vector.load %arg3[%c0_2, %c0_3] : memref<16x32xf32, #tpu.memory_space<vmem>>, vector<16x32xf32>
    %c0_4 = arith.constant 0 : index
    %c0_5 = arith.constant 0 : index
    %5 = vector.load %arg4[%c0_4, %c0_5] : memref<32x128xf32, #tpu.memory_space<vmem>>, vector<32x128xf32>
    %cst = arith.constant dense<0.000000e+00> : vector<16x128xf32>
    %6 = tpu.matmul %4, %5, %cst {dimension_numbers = #tpu.dot_dimension_numbers<[1], [0], [0], [1], [0, 0, 1, 1], [], []>} : vector<16x32xf32>, vector<32x128xf32>, vector<16x128xf32> -> vector<16x128xf32>
    %7 = arith.addf %3, %6 : vector<16x128xf32>
    %c0_6 = arith.constant 0 : index
    %c0_7 = arith.constant 0 : index
    %8 = vector.load %arg7[%c0_6, %c0_7] : memref<16x128xf32, #tpu.memory_space<vmem>>, vector<16x128xf32>
    tpu.vector_store %arg7[%c0_6, %c0_7], %7 {strides = array<i32>} : memref<16x128xf32, #tpu.memory_space<vmem>>, vector<16x128xf32>,
    %c0_i32_8 = arith.constant 0 : i32
    %9 = arith.cmpi eq, %arg2, %c0_i32_8 : i32
    %10 = arith.extui %9 : i1 to i32
    %c0_i32_9 = arith.constant 0 : i32
    %11 = arith.cmpi ne, %10, %c0_i32_9 : i32
    scf.if %11 {
      %c0_10 = arith.constant 0 : index
      %c0_11 = arith.constant 0 : index
      %12 = vector.load %arg7[%c0_10, %c0_11] : memref<16x128xf32, #tpu.memory_space<vmem>>, vector<16x128xf32>
      %c0_12 = arith.constant 0 : index
      %c0_13 = arith.constant 0 : index
      %13 = vector.load %arg5[%c0_12, %c0_13] : memref<1x128xf32, #tpu.memory_space<vmem>>, vector<1x128xf32>
      %14 = vector.broadcast %13 : vector<1x128xf32> to vector<16x128xf32>
      %15 = arith.addf %12, %14 : vector<16x128xf32>
      %cst_14 = arith.constant 5.000000e-01 : f32
      %16 = vector.broadcast %cst_14 : f32 to vector<16x128xf32>
      %17 = arith.mulf %16, %15 : vector<16x128xf32>
      %cst_15 = arith.constant 4.471500e-02 : f32
      %18 = vector.broadcast %cst_15 : f32 to vector<16x128xf32>
      %19 = arith.mulf %18, %15 : vector<16x128xf32>
      %20 = arith.mulf %19, %15 : vector<16x128xf32>
      %21 = arith.mulf %20, %15 : vector<16x128xf32>
      %22 = arith.addf %15, %21 : vector<16x128xf32>
      %cst_16 = arith.constant 0.797884583 : f32
      %23 = vector.broadcast %cst_16 : f32 to vector<16x128xf32>
      %24 = arith.mulf %23, %22 : vector<16x128xf32>
      %25 = math.tanh %24 : vector<16x128xf32>
      %cst_17 = arith.constant 1.000000e+00 : f32
      %26 = vector.broadcast %cst_17 : f32 to vector<16x128xf32>
      %27 = arith.addf %26, %25 : vector<16x128xf32>
      %28 = arith.mulf %17, %27 : vector<16x128xf32>
      %c0_18 = arith.constant 0 : index
      %c0_19 = arith.constant 0 : index
      %29 = vector.load %arg6[%c0_18, %c0_19] : memref<16x128xf32, #tpu.memory_space<vmem>>, vector<16x128xf32>
      tpu.vector_store %arg6[%c0_18, %c0_19], %28 {strides = array<i32>} : memref<16x128xf32, #tpu.memory_space<vmem>>, vector<16x128xf32>,
    } else {
    }
    return
  }
  func.func @transform_0(%arg0: i32, %arg1: i32, %arg2: i32) -> (i32, i32) {
    %c0_i32 = arith.constant 0 : i32
    return %arg0, %arg2 : i32, i32
  }
  func.func @transform_1(%arg0: i32, %arg1: i32, %arg2: i32) -> (i32, i32) {
    %c0_i32 = arith.constant 0 : i32
    return %arg2, %arg1 : i32, i32
  }
  func.func @transform_2(%arg0: i32, %arg1: i32, %arg2: i32) -> (i32, i32) {
    %c0_i32 = arith.constant 0 : i32
    %c0_i32_0 = arith.constant 0 : i32
    return %c0_i32, %arg1 : i32, i32
  }
  func.func @transform_3(%arg0: i32, %arg1: i32, %arg2: i32) -> (i32, i32) {
    %c0_i32 = arith.constant 0 : i32
    return %arg0, %arg1 : i32, i32
  }
}

module attributes {stable_mosaic.version = 11 : i64} {
  func.func @_linear_kernel(%arg0: i32, %arg1: i32, %arg2: i32, %arg3: memref<16x128xf32, #tpu.memory_space<vmem>>, %arg4: memref<128x32xf32, #tpu.memory_space<vmem>>, %arg5: memref<1x32xf32, #tpu.memory_space<vmem>>, %arg6: memref<16x32xf32, #tpu.memory_space<vmem>>, %arg7: memref<16x32xf32, #tpu.memory_space<vmem>>, %arg8: memref<16x32xf32, #tpu.memory_space<vmem>>) attributes {dimension_semantics = [#tpu.dimension_semantics<parallel>, #tpu.dimension_semantics<parallel>, #tpu.dimension_semantics<arbitrary>], iteration_bounds = array<i64: 1, 1, 1>, scalar_prefetch = 0 : i64, scratch_operands = 1 : i64, tpu.core_type = #tpu.core_type<tc>, window_params = [{transform_indices = @transform_0, window_bounds = array<i64: 16, 128>}, {transform_indices = @transform_1, window_bounds = array<i64: 128, 32>}, {transform_indices = @transform_2, window_bounds = array<i64: 1, 32>}, {transform_indices = @transform_3, window_bounds = array<i64: 16, 32>}, {transform_indices = @transform_4, window_bounds = array<i64: 16, 32>}]} {
    %c0_i32 = arith.constant 0 : i32
    %0 = arith.cmpi eq, %arg2, %c0_i32 : i32
    %1 = arith.extui %0 : i1 to i32
    %c0_i32_0 = arith.constant 0 : i32
    %2 = arith.cmpi ne, %1, %c0_i32_0 : i32
    scf.if %2 {
      %cst_10 = arith.constant 0.000000e+00 : f32
      %12 = vector.broadcast %cst_10 : f32 to vector<16x32xf32>
      %c0_11 = arith.constant 0 : index
      %c0_12 = arith.constant 0 : index
      %13 = vector.load %arg8[%c0_11, %c0_12] : memref<16x32xf32, #tpu.memory_space<vmem>>, vector<16x32xf32>
      tpu.vector_store %arg8[%c0_11, %c0_12], %12 {strides = array<i32>} : memref<16x32xf32, #tpu.memory_space<vmem>>, vector<16x32xf32>,
    } else {
    }
    %c0 = arith.constant 0 : index
    %c0_1 = arith.constant 0 : index
    %3 = vector.load %arg8[%c0, %c0_1] : memref<16x32xf32, #tpu.memory_space<vmem>>, vector<16x32xf32>
    %c0_2 = arith.constant 0 : index
    %c0_3 = arith.constant 0 : index
    %4 = vector.load %arg3[%c0_2, %c0_3] : memref<16x128xf32, #tpu.memory_space<vmem>>, vector<16x128xf32>
    %c0_4 = arith.constant 0 : index
    %c0_5 = arith.constant 0 : index
    %5 = vector.load %arg4[%c0_4, %c0_5] : memref<128x32xf32, #tpu.memory_space<vmem>>, vector<128x32xf32>
    %cst = arith.constant dense<0.000000e+00> : vector<16x32xf32>
    %6 = tpu.matmul %4, %5, %cst {dimension_numbers = #tpu.dot_dimension_numbers<[1], [0], [0], [1], [0, 0, 1, 1], [], []>} : vector<16x128xf32>, vector<128x32xf32>, vector<16x32xf32> -> vector<16x32xf32>
    %7 = arith.addf %3, %6 : vector<16x32xf32>
    %c0_6 = arith.constant 0 : index
    %c0_7 = arith.constant 0 : index
    %8 = vector.load %arg8[%c0_6, %c0_7] : memref<16x32xf32, #tpu.memory_space<vmem>>, vector<16x32xf32>
    tpu.vector_store %arg8[%c0_6, %c0_7], %7 {strides = array<i32>} : memref<16x32xf32, #tpu.memory_space<vmem>>, vector<16x32xf32>,
    %c0_i32_8 = arith.constant 0 : i32
    %9 = arith.cmpi eq, %arg2, %c0_i32_8 : i32
    %10 = arith.extui %9 : i1 to i32
    %c0_i32_9 = arith.constant 0 : i32
    %11 = arith.cmpi ne, %10, %c0_i32_9 : i32
    scf.if %11 {
      %c0_10 = arith.constant 0 : index
      %c0_11 = arith.constant 0 : index
      %12 = vector.load %arg8[%c0_10, %c0_11] : memref<16x32xf32, #tpu.memory_space<vmem>>, vector<16x32xf32>
      %c0_12 = arith.constant 0 : index
      %c0_13 = arith.constant 0 : index
      %13 = vector.load %arg5[%c0_12, %c0_13] : memref<1x32xf32, #tpu.memory_space<vmem>>, vector<1x32xf32>
      %14 = vector.broadcast %13 : vector<1x32xf32> to vector<16x32xf32>
      %15 = arith.addf %12, %14 : vector<16x32xf32>
      %c0_14 = arith.constant 0 : index
      %c0_15 = arith.constant 0 : index
      %16 = vector.load %arg6[%c0_14, %c0_15] : memref<16x32xf32, #tpu.memory_space<vmem>>, vector<16x32xf32>
      %17 = arith.addf %15, %16 : vector<16x32xf32>
      %c0_16 = arith.constant 0 : index
      %c0_17 = arith.constant 0 : index
      %18 = vector.load %arg7[%c0_16, %c0_17] : memref<16x32xf32, #tpu.memory_space<vmem>>, vector<16x32xf32>
      tpu.vector_store %arg7[%c0_16, %c0_17], %17 {strides = array<i32>} : memref<16x32xf32, #tpu.memory_space<vmem>>, vector<16x32xf32>,
    } else {
    }
    return
  }
  func.func @transform_0(%arg0: i32, %arg1: i32, %arg2: i32) -> (i32, i32) {
    %c0_i32 = arith.constant 0 : i32
    return %arg0, %arg2 : i32, i32
  }
  func.func @transform_1(%arg0: i32, %arg1: i32, %arg2: i32) -> (i32, i32) {
    %c0_i32 = arith.constant 0 : i32
    return %arg2, %arg1 : i32, i32
  }
  func.func @transform_2(%arg0: i32, %arg1: i32, %arg2: i32) -> (i32, i32) {
    %c0_i32 = arith.constant 0 : i32
    %c0_i32_0 = arith.constant 0 : i32
    return %c0_i32, %arg1 : i32, i32
  }
  func.func @transform_3(%arg0: i32, %arg1: i32, %arg2: i32) -> (i32, i32) {
    %c0_i32 = arith.constant 0 : i32
    return %arg0, %arg1 : i32, i32
  }
  func.func @transform_4(%arg0: i32, %arg1: i32, %arg2: i32) -> (i32, i32) {
    %c0_i32 = arith.constant 0 : i32
    return %arg0, %arg1 : i32, i32
  }
}

module attributes {stable_mosaic.version = 11 : i64} {
  func.func @_linear_kernel(%arg0: i32, %arg1: i32, %arg2: i32, %arg3: memref<16x32xf32, #tpu.memory_space<vmem>>, %arg4: memref<32x32xf32, #tpu.memory_space<vmem>>, %arg5: memref<1x32xf32, #tpu.memory_space<vmem>>, %arg6: memref<16x32xf32, #tpu.memory_space<vmem>>, %arg7: memref<16x32xf32, #tpu.memory_space<vmem>>, %arg8: memref<16x32xf32, #tpu.memory_space<vmem>>) attributes {dimension_semantics = [#tpu.dimension_semantics<parallel>, #tpu.dimension_semantics<parallel>, #tpu.dimension_semantics<arbitrary>], iteration_bounds = array<i64: 1, 1, 1>, scalar_prefetch = 0 : i64, scratch_operands = 1 : i64, tpu.core_type = #tpu.core_type<tc>, window_params = [{transform_indices = @transform_0, window_bounds = array<i64: 16, 32>}, {transform_indices = @transform_1, window_bounds = array<i64: 32, 32>}, {transform_indices = @transform_2, window_bounds = array<i64: 1, 32>}, {transform_indices = @transform_3, window_bounds = array<i64: 16, 32>}, {transform_indices = @transform_4, window_bounds = array<i64: 16, 32>}]} {
    %c0_i32 = arith.constant 0 : i32
    %0 = arith.cmpi eq, %arg2, %c0_i32 : i32
    %1 = arith.extui %0 : i1 to i32
    %c0_i32_0 = arith.constant 0 : i32
    %2 = arith.cmpi ne, %1, %c0_i32_0 : i32
    scf.if %2 {
      %cst_10 = arith.constant 0.000000e+00 : f32
      %12 = vector.broadcast %cst_10 : f32 to vector<16x32xf32>
      %c0_11 = arith.constant 0 : index
      %c0_12 = arith.constant 0 : index
      %13 = vector.load %arg8[%c0_11, %c0_12] : memref<16x32xf32, #tpu.memory_space<vmem>>, vector<16x32xf32>
      tpu.vector_store %arg8[%c0_11, %c0_12], %12 {strides = array<i32>} : memref<16x32xf32, #tpu.memory_space<vmem>>, vector<16x32xf32>,
    } else {
    }
    %c0 = arith.constant 0 : index
    %c0_1 = arith.constant 0 : index
    %3 = vector.load %arg8[%c0, %c0_1] : memref<16x32xf32, #tpu.memory_space<vmem>>, vector<16x32xf32>
    %c0_2 = arith.constant 0 : index
    %c0_3 = arith.constant 0 : index
    %4 = vector.load %arg3[%c0_2, %c0_3] : memref<16x32xf32, #tpu.memory_space<vmem>>, vector<16x32xf32>
    %c0_4 = arith.constant 0 : index
    %c0_5 = arith.constant 0 : index
    %5 = vector.load %arg4[%c0_4, %c0_5] : memref<32x32xf32, #tpu.memory_space<vmem>>, vector<32x32xf32>
    %cst = arith.constant dense<0.000000e+00> : vector<16x32xf32>
    %6 = tpu.matmul %4, %5, %cst {dimension_numbers = #tpu.dot_dimension_numbers<[1], [0], [0], [1], [0, 0, 1, 1], [], []>} : vector<16x32xf32>, vector<32x32xf32>, vector<16x32xf32> -> vector<16x32xf32>
    %7 = arith.addf %3, %6 : vector<16x32xf32>
    %c0_6 = arith.constant 0 : index
    %c0_7 = arith.constant 0 : index
    %8 = vector.load %arg8[%c0_6, %c0_7] : memref<16x32xf32, #tpu.memory_space<vmem>>, vector<16x32xf32>
    tpu.vector_store %arg8[%c0_6, %c0_7], %7 {strides = array<i32>} : memref<16x32xf32, #tpu.memory_space<vmem>>, vector<16x32xf32>,
    %c0_i32_8 = arith.constant 0 : i32
    %9 = arith.cmpi eq, %arg2, %c0_i32_8 : i32
    %10 = arith.extui %9 : i1 to i32
    %c0_i32_9 = arith.constant 0 : i32
    %11 = arith.cmpi ne, %10, %c0_i32_9 : i32
    scf.if %11 {
      %c0_10 = arith.constant 0 : index
      %c0_11 = arith.constant 0 : index
      %12 = vector.load %arg8[%c0_10, %c0_11] : memref<16x32xf32, #tpu.memory_space<vmem>>, vector<16x32xf32>
      %c0_12 = arith.constant 0 : index
      %c0_13 = arith.constant 0 : index
      %13 = vector.load %arg5[%c0_12, %c0_13] : memref<1x32xf32, #tpu.memory_space<vmem>>, vector<1x32xf32>
      %14 = vector.broadcast %13 : vector<1x32xf32> to vector<16x32xf32>
      %15 = arith.addf %12, %14 : vector<16x32xf32>
      %c0_14 = arith.constant 0 : index
      %c0_15 = arith.constant 0 : index
      %16 = vector.load %arg6[%c0_14, %c0_15] : memref<16x32xf32, #tpu.memory_space<vmem>>, vector<16x32xf32>
      %17 = arith.addf %15, %16 : vector<16x32xf32>
      %c0_16 = arith.constant 0 : index
      %c0_17 = arith.constant 0 : index
      %18 = vector.load %arg7[%c0_16, %c0_17] : memref<16x32xf32, #tpu.memory_space<vmem>>, vector<16x32xf32>
      tpu.vector_store %arg7[%c0_16, %c0_17], %17 {strides = array<i32>} : memref<16x32xf32, #tpu.memory_space<vmem>>, vector<16x32xf32>,
    } else {
    }
    return
  }
  func.func @transform_0(%arg0: i32, %arg1: i32, %arg2: i32) -> (i32, i32) {
    %c0_i32 = arith.constant 0 : i32
    return %arg0, %arg2 : i32, i32
  }
  func.func @transform_1(%arg0: i32, %arg1: i32, %arg2: i32) -> (i32, i32) {
    %c0_i32 = arith.constant 0 : i32
    return %arg2, %arg1 : i32, i32
  }
  func.func @transform_2(%arg0: i32, %arg1: i32, %arg2: i32) -> (i32, i32) {
    %c0_i32 = arith.constant 0 : i32
    %c0_i32_0 = arith.constant 0 : i32
    return %c0_i32, %arg1 : i32, i32
  }
  func.func @transform_3(%arg0: i32, %arg1: i32, %arg2: i32) -> (i32, i32) {
    %c0_i32 = arith.constant 0 : i32
    return %arg0, %arg1 : i32, i32
  }
  func.func @transform_4(%arg0: i32, %arg1: i32, %arg2: i32) -> (i32, i32) {
    %c0_i32 = arith.constant 0 : i32
    return %arg0, %arg1 : i32, i32
  }
}

</mosaic_0001>

<bundles_post_ra>
// kernel: gpt2_block_forward.7
= control target key start
LH: loop header
LB: loop body
LE: loop exit
PB: predicated region body
PF: predicated region fallthrough
CT: control target
= control target key end

     0   :  { %vm16_vm0 = vcmask 261120   ;;  %s118_s0 = inlined_call_operand.vmem [shape: f32[16,32], index: 0, kind: input, shape index: {}]   ;;  %s119_s1 = inlined_call_operand.vmem [shape: f32[1,32], index: 1, kind: input, shape index: {}]   ;;  %s120_s2 = inlined_call_operand.vmem [shape: f32[1,32], index: 2, kind: input, shape index: {}]   ;;  %s121_s3 = inlined_call_operand.vmem [shape: f32[16,32], index: 3, kind: output, shape index: {}]  }
   0x1   :  { %v14_v0 = vld [vmem:[%s118_s0] sm:$0xff]  ;;  %v15_v1 = vld [vmem:[%s118_s0 + $0x8] sm:$0xff] }
   0x2   :  { %v17_v2 = vsel %vm16_vm0, %v14_v0, 0.0  ;;  %v20_v3 = vsel %vm16_vm0, %v15_v1, 0.0  ;;  %v68_v21 = vld [vmem:[%s119_s1] ss:$0 sm:$0xff] }
   0x3   :  { %18 = vadd.xlane.f32.xlu0 %v17_v2  ;;  %v69_v23 = vld [vmem:[%s120_s2] ss:$0 sm:$0xff] }
   0x7   :  { %21 = vadd.xlane.f32.xlu0 %v20_v3 }
  0x8c   :  { %v19_v4 = vpop.xlane.xlu0 %18 }
  0x8d   :  { %v24_v5 = vmul.f32 0.03125, %v19_v4 }
  0x8f   :  { %v26_v6 = vsub.f32 %v14_v0, %v24_v5 }
  0x90   :  { %v22_v7 = vpop.xlane.xlu0 %21 }
  0x91   :  { %v25_v8 = vmul.f32 0.03125, %v22_v7  ;;  %v28_v9 = vmul.f32 %v26_v6, %v26_v6 }
  0x93   :  { %v27_v10 = vsub.f32 %v15_v1, %v25_v8  ;;  %v30_v11 = vsel %vm16_vm0, %v28_v9, 0.0 }
  0x94   :  { %31 = vadd.xlane.f32.xlu1 %v30_v11 }
  0x95   :  { %v29_v12 = vmul.f32 %v27_v10, %v27_v10 }
  0x97   :  { %v33_v13 = vsel %vm16_vm0, %v29_v12, 0.0 }
  0x98   :  { %34 = vadd.xlane.f32.xlu1 %v33_v13 }
 0x11d   :  { %v32_v14 = vpop.xlane.xlu1 %31 }
 0x11e   :  { %v36_v15 = vmul.f32 0.03125, %v32_v14 }
 0x120   :  { %v38_v16 = vadd.f32 1e-05, %v36_v15 }
 0x121   :  { %v35_v17 = vpop.xlane.xlu1 %34 }
 0x122   :  { %70 = vrsqrt.f32 %v38_v16  ;;  %v37_v18 = vmul.f32 0.03125, %v35_v17 }
 0x124   :  { %v39_v19 = vadd.f32 1e-05, %v37_v18 }
 0x126   :  { %72 = vrsqrt.f32 %v39_v19 }
 0x12f   :  { %v71_v20 = vpop.eup %70 }
 0x130   :  { %v42_v22 = vmul.f32 %v71_v20, %v26_v6 }
 0x132   :  { %v51_v24 = vmul.f32 %v68_v21, %v42_v22 }
 0x133   :  { %v73_v25 = vpop.eup %72 }
 0x134   :  { %v60_v26 = vadd.f32 %v69_v23, %v51_v24  ;;  %v43_v27 = vmul.f32 %v73_v25, %v27_v10 }
 0x136   :  { %62 = vst.msk [vmem:[%s121_s3] sm:$0xff] %vm16_vm0, %v60_v26  ;;  %v52_v28 = vmul.f32 %v68_v21, %v43_v27 }
 0x138   :  { %v61_v29 = vadd.f32 %v69_v23, %v52_v28 }
 0x13a   :  { %63 = vst.msk [vmem:[%s121_s3 + $0x8] sm:$0xff] %vm16_vm0, %v61_v29 }

// kernel: gpt2_block_forward.8
= control target key start
LH: loop header
LB: loop body
LE: loop exit
PB: predicated region body
PF: predicated region fallthrough
CT: control target
= control target key end

     0   :  { %vm29_vm0 = vcmask 261120   ;;  %vm18_vm1 = vcmask 785408   ;;  %v157_v2 = vmov 0.0   ;;  %s213_s1 = inlined_call_operand.vmem [shape: f32[32,96], index: 1, kind: input, shape index: {}]   ;;  %s214_s0 = inlined_call_operand.vmem [shape: f32[16,32], index: 0, kind: input, shape index: {}]   ;;  %s215_s2 = inlined_call_operand.vmem [shape: f32[1,96], index: 2, kind: input, shape index: {}]   ;;  %s216_s3 = inlined_call_operand.vmem [shape: f32[16,96], index: 3, kind: output, shape index: {}]  }
   0x1   :  { %v28_v0 = vld [vmem:[%s213_s1 + $0x18] sm:$0xff]  ;;  %v27_v1 = vld [vmem:[%s213_s1 + $0x10] sm:$0xff]  ;;  %20 = vst.msk [vmem:[#allocation2 + $0x8] sm:$0xff] %vm18_vm1, %v157_v2  ;;  %19 = vst.msk [vmem:[#allocation2] sm:$0xff] %vm18_vm1, %v157_v2 }
   0x2   :  { %145 = vmatprep.subr.mxu0 %v28_v0  ;;  %v23_v3 = vld [vmem:[%s214_s0] sm:$0xff]  ;;  %v26_v4 = vld [vmem:[%s213_s1 + $0x8] sm:$0xff] }
   0x3   :  { %146 = vmatpush3.msra.mxu0 %v28_v0  ;;  %153 = vmatprep.mubr.msk.f32.mxu0 %vm29_vm0, %v23_v3  ;;  %v25_v5 = vld [vmem:[%s213_s1] sm:$0xff]  ;;  %v24_v6 = vld [vmem:[%s214_s0 + $0x8] sm:$0xff] }
   0x4   :  { %147 = vmatprep.subr.mxu0 %v27_v1  ;;  %v138_v13 = vld [vmem:[%s215_s2] ss:$0 sm:$0xff] }
   0x5   :  { %148 = vmatpush3.msra.mxu0 %v27_v1 }
   0x6   :  { %149 = vmatprep.subr.mxu0 %v26_v4 }
   0x7   :  { %150 = vmatpush3.msra.mxu0 %v26_v4 }
   0x8   :  { %151 = vmatprep.subr.mxu0 %v25_v5  ;;  %v22_v7 = vld [vmem:[#allocation2 + $0x8] sm:$0xff]  ;;  %v21_v9 = vld [vmem:[#allocation2] sm:$0xff] }
   0x9   :  { %152 = vmatpush3.msra.mxu0 %v25_v5 }
   0xa   :  { %154 = vmatmul.mubr.msk.f32.vlgmr.msra.gmra.mxu0 %vm29_vm0, %v24_v6 }
  0xca   :  { %v155_v8 = vpop.f32.mrf.mxu0 }
  0xcb   :  { %v112_v10 = vadd.f32 %v155_v8, %v22_v7 }
  0xcc   :  { %v102_v11 = vpop.f32.mrf.mxu0 }
  0xcd   :  { %115 = vst.msk [vmem:[#allocation2 + $0x8] sm:$0xff] %vm18_vm1, %v112_v10  ;;  %v111_v12 = vadd.f32 %v102_v11, %v21_v9 }
  0xcf   :  { %114 = vst.msk [vmem:[#allocation2] sm:$0xff] %vm18_vm1, %v111_v12 }
  0xd4   :  { %v120_v14 = vld [vmem:[#allocation2 + $0x8] sm:$0xff] }
  0xd5   :  { %v129_v15 = vadd.f32 %v138_v13, %v120_v14 }
  0xd6   :  { %v119_v16 = vld [vmem:[#allocation2] sm:$0xff] }
  0xd7   :  { %131 = vst.msk [vmem:[%s216_s3 + $0x8] sm:$0xff] %vm18_vm1, %v129_v15  ;;  %v128_v17 = vadd.f32 %v138_v13, %v119_v16 }
  0xd9   :  { %130 = vst.msk [vmem:[%s216_s3] sm:$0xff] %vm18_vm1, %v128_v17 }

// kernel: gpt2_block_forward.9
= control target key start
LH: loop header
LB: loop body
LE: loop exit
PB: predicated region body
PF: predicated region fallthrough
CT: control target
= control target key end

     0   :  { %s521_s12 = smov 0   ;;  %s556_s0 = inlined_call_operand.vmem [shape: f32[8,8,8], index: 0, kind: input, shape index: {}]   ;;  %s557_s1 = inlined_call_operand.vmem [shape: f32[8,8,8], index: 1, kind: input, shape index: {}]   ;;  %s558_s2 = inlined_call_operand.vmem [shape: f32[8,8,8], index: 2, kind: input, shape index: {}]   ;;  %s559_s3 = inlined_call_operand.vmem [shape: f32[8,8,8], index: 3, kind: output, shape index: {}]  }
   0x1 LB: > { %s449_s13 = sadd.s32 4294967295, %s497_s12   ;;  %p453_p0 = scmp.ge.s32.totalorder %s497_s12, 1  ;;  %s497_s12 = sphi %s521_s12, %s13_s12  }
   0x2   : > { %p154_p1 = scmp.lt.s32.totalorder %s497_s12, 9 }
   0x4   : > { %p155_p2 = pnand %p453_p0, %p154_p1 }
   0x5   : > { %p184_p3 = scmp.lt.s32.totalorder (!%p155_p2), %s449_s13, 7 }
   0x6   : > { %158 = sbr.rel (%p155_p2) target bundleno = 721 (0x2d1), region = 32 }
   0xb   : > { %v499_v0 = vmov 0.0   ;;  %vm500_vm0 = vmmov 0   ;;  %s561_s13 = smov (!%p184_p3, %s449_s13), 7  ;;  %vm203_vm1 = vcmask 64512   ;;  %v281_v3 = vlaneseq }
   0xc   : > { %467 = vmatprep.subr.mxu0 %v499_v0  ;;  %469 = vmatprep.mubr.msk.f32.mxu0 %vm500_vm0, %v499_v0  ;;  %s529_s14 = sshll.u32 %s561_s13, 3 }
   0xd   : > { %472 = vmatprep.subr.mxu1 %v499_v0  ;;  %474 = vmatprep.mubr.msk.f32.mxu1 %vm500_vm0, %v499_v0  ;;  %s191_s17 = scalar_lea.vmem %s557_s1, %s529_s14  ;;  %s187_s20 = scalar_lea.vmem %s556_s0, %s529_s14  ;;  %v282_v4 = vshrl.u32 %v281_v3, 7  ;;  %v284_v5 = vand.u32 127, %v281_v3 }
   0xe   : > { %v201_v1 = vld [vmem:[%s191_s17] sm:$0xff]  ;;  %s195_s23 = scalar_lea.vmem %s558_s2, %s529_s14  ;;  %s199_s26 = scalar_lea.vmem %s559_s3, %s529_s14 }
   0xf   : > { %468 = vmatpush3.xpose.msk.msra.mxu0 %vm203_vm1, %v201_v1  ;;  %v200_v2 = vld [vmem:[%s187_s20] sm:$0xff]  ;;  %vm285_vm2 = vcmp.ge.s32.totalorder %v282_v4, %v284_v5 }
  0x10   : > { %v202_v16 = vld [vmem:[%s195_s23] sm:$0xff] }
  0x11   : > { %473 = vmatpush3.msra.mxu1 %v202_v16 }
  0x12   : > { %470 = vmatmul.mubr.msk.f32.vlgmr.msra.gmra.mxu0 %vm203_vm1, %v200_v2 }
  0xd2   : > { %v276_v6 = vpop.f32.mrf.mxu0 }
  0xd3   : > { %v280_v7 = vmul.f32 0.35355338, %v276_v6 }
  0xd4   : > { %v471_v8 = vpop.f32.mrf.mxu0 }
  0xd5   : > { %v286_v9 = vsel %vm285_vm2, %v280_v7, -10000.0 }
  0xd6   : > { %v287_v10 = vsel %vm203_vm1, %v286_v9, -inf }
  0xd7   : > { %288 = vmax.xlane.f32.xlu0 %v287_v10 }
 0x160   : > { %v289_v11 = vpop.xlane.xlu0 %288 }
 0x161   : > { %v290_v12 = vsub.f32 %v286_v9, %v289_v11 }
 0x163   : > { %v291_v13 = vmul.f32 1.442695, %v290_v12 }
 0x165   : > { %487 = vpow2.f32 %v291_v13 }
 0x172   : > { %v488_v14 = vpop.eup %487 }
 0x173   : > { %v293_v15 = vsel %vm203_vm1, %v488_v14, 0.0 }
 0x174   : > { %294 = vadd.xlane.f32.xlu0 %v293_v15 }
 0x1fd   : > { %v295_v17 = vpop.xlane.xlu0 %294 }
 0x1fe   : > { %489 = vrcp.f32 %v295_v17 }
 0x20b   : > { %v490_v18 = vpop.eup %489 }
 0x20c   : > { %v297_v19 = vmul.f32 %v490_v18, %v488_v14 }
 0x20e   : > { %475 = vmatmul.mubr.msk.f32.vlgmr.msra.gmra.mxu1 %vm203_vm1, %v297_v19 }
 0x2ce   : > { %v367_v20 = vpop.f32.mrf.mxu1 }
 0x2cf   : > { %371 = vst.msk [vmem:[%s199_s26] sm:$0xff] %vm203_vm1, %v367_v20 }
 0x2d0   : > { %v476_v21 = vpop.f32.mrf.mxu1 }
 0x2d1 PF: > { %s13_s12 = sadd.s32 1, %s497_s12  }
 0x2d2   : > { %p10_p4 = scmp.ge.s32.totalorder %s13_s12, 10  }
 0x2d4   :  { %12 = sbr.rel (!%p10_p4) target bundleno = 1 (0x1), region = 68 }

// kernel: gpt2_block_forward.12
= control target key start
LH: loop header
LB: loop body
LE: loop exit
PB: predicated region body
PF: predicated region fallthrough
CT: control target
= control target key end

     0   :  { %vm28_vm0 = vcmask 261120   ;;  %s225_s1 = inlined_call_operand.vmem [shape: f32[32,128], index: 1, kind: input, shape index: {}]   ;;  %s226_s0 = inlined_call_operand.vmem [shape: f32[16,32], index: 0, kind: input, shape index: {}]   ;;  %s227_s2 = inlined_call_operand.vmem [shape: f32[1,128], index: 2, kind: input, shape index: {}]   ;;  %s228_s3 = inlined_call_operand.vmem [shape: f32[16,128], index: 3, kind: output, shape index: {}]  }
   0x1   :  { %v27_v0 = vld [vmem:[%s225_s1 + $0x18] sm:$0xff]  ;;  %v26_v1 = vld [vmem:[%s225_s1 + $0x10] sm:$0xff]  ;;  %v22_v2 = vld [vmem:[%s226_s0] sm:$0xff] }
   0x2   :  { %161 = vmatprep.subr.mxu0 %v27_v0  ;;  %v25_v3 = vld [vmem:[%s225_s1 + $0x8] sm:$0xff]  ;;  %169 = vmatprep.mubr.msk.f32.mxu0 %vm28_vm0, %v22_v2  ;;  %v24_v4 = vld [vmem:[%s225_s1] sm:$0xff] }
   0x3   :  { %162 = vmatpush3.msra.mxu0 %v27_v0  ;;  %v23_v5 = vld [vmem:[%s226_s0 + $0x8] sm:$0xff]  ;;  %v154_v6 = vld [vmem:[%s227_s2] ss:$0 sm:$0xff] }
   0x4   :  { %163 = vmatprep.subr.mxu0 %v26_v1 }
   0x5   :  { %164 = vmatpush3.msra.mxu0 %v26_v1 }
   0x6   :  { %165 = vmatprep.subr.mxu0 %v25_v3 }
   0x7   :  { %166 = vmatpush3.msra.mxu0 %v25_v3 }
   0x8   :  { %167 = vmatprep.subr.mxu0 %v24_v4 }
   0x9   :  { %168 = vmatpush3.msra.mxu0 %v24_v4 }
   0xa   :  { %170 = vmatmul.mubr.msk.f32.vlgmr.msra.gmra.mxu0 %vm28_vm0, %v23_v5 }
  0xca   :  { %v171_v7 = vpop.f32.mrf.mxu0 }
  0xcb   :  { %v127_v8 = vadd.f32 %v171_v7, %v154_v6 }
  0xcc   :  { %v101_v9 = vpop.f32.mrf.mxu0 }
  0xcd   :  { %v131_v10 = vmul.f32 0.044715, %v127_v8  ;;  %v126_v11 = vadd.f32 %v154_v6, %v101_v9  ;;  %v129_v22 = vmul.f32 0.5, %v127_v8 }
  0xcf   :  { %v133_v12 = vmul.f32 %v131_v10, %v127_v8  ;;  %v130_v13 = vmul.f32 0.044715, %v126_v11  ;;  %v128_v26 = vmul.f32 0.5, %v126_v11 }
  0xd1   :  { %v135_v14 = vmul.f32 %v133_v12, %v127_v8  ;;  %v132_v15 = vmul.f32 %v130_v13, %v126_v11 }
  0xd3   :  { %v137_v16 = vadd.f32 %v135_v14, %v127_v8  ;;  %v134_v17 = vmul.f32 %v132_v15, %v126_v11 }
  0xd5   :  { %v139_v18 = vmul.f32 0.7978846, %v137_v16  ;;  %v136_v19 = vadd.f32 %v134_v17, %v126_v11 }
  0xd7   :  { %172 = vtanh.f32 %v139_v18  ;;  %v138_v20 = vmul.f32 0.7978846, %v136_v19 }
  0xd9   :  { %174 = vtanh.f32 %v138_v20 }
  0xe4   :  { %v173_v21 = vpop.eup %172 }
  0xe5   :  { %v143_v23 = vadd.f32 1.0, %v173_v21 }
  0xe6   :  { %v175_v24 = vpop.eup %174 }
  0xe7   :  { %v145_v25 = vmul.f32 %v143_v23, %v129_v22  ;;  %v142_v27 = vadd.f32 1.0, %v175_v24 }
  0xe9   :  { %147 = vst [vmem:[%s228_s3 + $0x8] sm:$0xff] %v145_v25  ;;  %v144_v28 = vmul.f32 %v142_v27, %v128_v26 }
  0xeb   :  { %146 = vst [vmem:[%s228_s3] sm:$0xff] %v144_v28 }

// kernel: gpt2_block_forward.13
= control target key start
LH: loop header
LB: loop body
LE: loop exit
PB: predicated region body
PF: predicated region fallthrough
CT: control target
= control target key end

     0   :  { %vm22_vm0 = vcmask 261120   ;;  %v241_v2 = vmov 0.0   ;;  %s342_s0 = inlined_call_operand.vmem [shape: f32[16,128], index: 0, kind: input, shape index: {}]   ;;  %s343_s1 = inlined_call_operand.vmem [shape: f32[128,32], index: 1, kind: input, shape index: {}]   ;;  %s344_s2 = inlined_call_operand.vmem [shape: f32[1,32], index: 2, kind: input, shape index: {}]   ;;  %s345_s3 = inlined_call_operand.vmem [shape: f32[16,32], index: 3, kind: input, shape index: {}]   ;;  %s346_s4 = inlined_call_operand.hbm [shape: f32[16,32], index: 4, kind: output, shape index: {}]  }
   0x1   :  { %v44_v0 = vld [vmem:[%s343_s1 + $0x78] sm:$0xff]  ;;  %v43_v1 = vld [vmem:[%s343_s1 + $0x70] sm:$0xff]  ;;  %24 = vst.msk [vmem:[#allocation2 + $0x8] sm:$0xff] %vm22_vm0, %v241_v2  ;;  %23 = vst.msk [vmem:[#allocation2] sm:$0xff] %vm22_vm0, %v241_v2 }
   0x2   :  { %180 = vmatprep.subr.mxu0 %v44_v0  ;;  %v42_v3 = vld [vmem:[%s343_s1 + $0x68] sm:$0xff]  ;;  %v41_v4 = vld [vmem:[%s343_s1 + $0x60] sm:$0xff]  ;;  %v40_v6 = vld [vmem:[%s343_s1 + $0x58] sm:$0xff] }
   0x3   :  { %181 = vmatpush3.msra.mxu0 %v44_v0  ;;  %v27_v5 = vld [vmem:[%s342_s0] sm:$0xff] }
   0x4   :  { %182 = vmatprep.subr.mxu0 %v43_v1  ;;  %212 = vmatprep.mubr.f32.mxu0 %v27_v5 }
   0x5   :  { %183 = vmatpush3.msra.mxu0 %v43_v1 }
   0x6   :  { %184 = vmatprep.subr.mxu0 %v42_v3 }
   0x7   :  { %185 = vmatpush3.msra.mxu0 %v42_v3 }
   0x8   :  { %9 = vsyncpa [#allocation4], 0  ;;  %186 = vmatprep.subr.mxu0 %v41_v4  ;;  %v39_v7 = vld [vmem:[%s343_s1 + $0x50] sm:$0xff]  ;;  %v38_v8 = vld [vmem:[%s343_s1 + $0x48] sm:$0xff]  ;;  %s242_s27 = smov [#allocation3]  }
   0x9   :  { %187 = vmatpush3.msra.mxu0 %v41_v4  ;;  %v37_v9 = vld [vmem:[%s343_s1 + $0x40] sm:$0xff]  ;;  %v36_v10 = vld [vmem:[%s343_s1 + $0x38] sm:$0xff]  ;;  %v35_v11 = vld [vmem:[%s343_s1 + $0x30] sm:$0xff]  ;;  %s150_s28 = sshll.u32 %s242_s27, 4  ;;  %s151_s28 = int_to_ptr.vmem [resolvable:$true] %s150_s28 }
   0xa   :  { %188 = vmatprep.subr.mxu0 %v40_v6  ;;  %v34_v12 = vld [vmem:[%s343_s1 + $0x28] sm:$0xff]  ;;  %v33_v13 = vld [vmem:[%s343_s1 + $0x20] sm:$0xff]  ;;  %v32_v14 = vld [vmem:[%s343_s1 + $0x18] sm:$0xff]  ;;  %p224_p1 = scmp.lt.s32.totalorder %s151_s28, %s151_s28 }
   0xb   :  { %189 = vmatpush3.msra.mxu0 %v40_v6  ;;  %v31_v15 = vld [vmem:[%s343_s1 + $0x10] sm:$0xff]  ;;  %v30_v16 = vld [vmem:[%s343_s1 + $0x8] sm:$0xff]  ;;  %v29_v17 = vld [vmem:[%s343_s1] sm:$0xff] }
   0xc   :  { %190 = vmatprep.subr.mxu0 %v39_v7  ;;  %v28_v18 = vld [vmem:[%s342_s0 + $0x8] sm:$0xff]  ;;  %v25_v21 = vld [vmem:[#allocation2] sm:$0xff] }
   0xd   :  { %191 = vmatpush3.msra.mxu0 %v39_v7  ;;  %v26_v19 = vld [vmem:[#allocation2 + $0x8] sm:$0xff]  ;;  %v161_v25 = vld [vmem:[%s344_s2] ss:$0 sm:$0xff]  ;;  %s219_s2 = scalar_lea.vmem %s151_s28, 256 }
   0xe   :  { %192 = vmatprep.subr.mxu0 %v38_v8  ;;  %v140_v27 = vld [vmem:[%s345_s3 + $0x8] sm:$0xff]  ;;  %v139_v30 = vld [vmem:[%s345_s3] sm:$0xff]  ;;  %p220_p0 = scmp.ne.s32.totalorder %s151_s28, %s219_s2  ;;  %p225_p2 = scmp.lt.s32.totalorder %s219_s2, %s219_s2 }
   0xf   :  { %193 = vmatpush3.msra.mxu0 %v38_v8 }
  0x10   :  { %194 = vmatprep.subr.mxu0 %v37_v9  ;;  %p226_p3 = por %p225_p2, %p224_p1 }
  0x11   :  { %195 = vmatpush3.msra.mxu0 %v37_v9 }
  0x12   :  { %196 = vmatprep.subr.mxu0 %v36_v10  ;;  %p227_p4 = pnand %p226_p3, %p220_p0 }
  0x13   :  { %197 = vmatpush3.msra.mxu0 %v36_v10 }
  0x14   :  { %198 = vmatprep.subr.mxu0 %v35_v11 }
  0x15   :  { %199 = vmatpush3.msra.mxu0 %v35_v11 }
  0x16   :  { %200 = vmatprep.subr.mxu0 %v34_v12 }
  0x17   :  { %201 = vmatpush3.msra.mxu0 %v34_v12 }
  0x18   :  { %202 = vmatprep.subr.mxu0 %v33_v13 }
  0x19   :  { %203 = vmatpush3.msra.mxu0 %v33_v13 }
  0x1a   :  { %204 = vmatprep.subr.mxu0 %v32_v14 }
  0x1b   :  { %205 = vmatpush3.msra.mxu0 %v32_v14 }
  0x1c   :  { %206 = vmatprep.subr.mxu0 %v31_v15 }
  0x1d   :  { %207 = vmatpush3.msra.mxu0 %v31_v15 }
  0x1e   :  { %208 = vmatprep.subr.mxu0 %v30_v16 }
  0x1f   :  { %209 = vmatpush3.msra.mxu0 %v30_v16 }
  0x20   :  { %210 = vmatprep.subr.mxu0 %v29_v17 }
  0x21   :  { %211 = vmatpush3.msra.mxu0 %v29_v17 }
  0x22   :  { %213 = vmatmul.mubr.f32.vlgmr.msra.gmra.mxu0 %v28_v18 }
  0xe2   :  { %v214_v20 = vpop.f32.mrf.mxu0 }
  0xe3   :  { %v121_v22 = vadd.f32 %v214_v20, %v26_v19 }
  0xe4   :  { %v111_v23 = vpop.f32.mrf.mxu0 }
  0xe5   :  { %124 = vst.msk [vmem:[#allocation2 + $0x8] sm:$0xff] %vm22_vm0, %v121_v22  ;;  %v120_v24 = vadd.f32 %v111_v23, %v25_v21 }
  0xe7   :  { %123 = vst.msk [vmem:[#allocation2] sm:$0xff] %vm22_vm0, %v120_v24 }
  0xec   :  { %v129_v26 = vld [vmem:[#allocation2 + $0x8] sm:$0xff] }
  0xed   :  { %v138_v28 = vadd.f32 %v161_v25, %v129_v26 }
  0xee   :  { %v128_v29 = vld [vmem:[#allocation2] sm:$0xff] }
  0xef   :  { %v137_v31 = vadd.f32 %v161_v25, %v128_v29  ;;  %v142_v32 = vadd.f32 %v140_v27, %v138_v28 }
  0xf1   :  { %v141_v33 = vadd.f32 %v139_v30, %v137_v31  ;;  %144 = vst.msk [vmem:[#allocation3 + $0x8] sm:$0xff] %vm22_vm0, %v142_v32 }
  0xf3   :  { %143 = vst.msk [vmem:[#allocation3] sm:$0xff] %vm22_vm0, %v141_v33 }
  0xf4   :  { %230 = shalt.err (!%p227_p4)
}
  0xf5   :  { %s243_s5 = smov 128   ;;  %s244_s6 = smov 8  }
  0xf6   :  { %156 = dma.vmem_to_hbm [thread:$0]  %s151_s28, 256, %s346_s4, [#allocation4], %s243_s5, %s243_s5, %s244_s6  }
  0xf7   :  { %239 = dma.done.wait [#allocation4], 256  }
  0xf8   :  { %240 = vsyncadd [#allocation4], 4294967040 }
  0xf9   :  { %160 = vsyncpa [#allocation4], 1 }

// kernel: gpt2_block_forward.10
= control target key start
LH: loop header
LB: loop body
LE: loop exit
PB: predicated region body
PF: predicated region fallthrough
CT: control target
= control target key end

     0   :  { %vm21_vm0 = vcmask 261120   ;;  %v163_v2 = vmov 0.0   ;;  %s230_s1 = inlined_call_operand.vmem [shape: f32[32,32], index: 1, kind: input, shape index: {}]   ;;  %s231_s0 = inlined_call_operand.vmem [shape: f32[16,32], index: 0, kind: input, shape index: {}]   ;;  %s232_s2 = inlined_call_operand.vmem [shape: f32[1,32], index: 2, kind: input, shape index: {}]   ;;  %s233_s3 = inlined_call_operand.vmem [shape: f32[16,32], index: 3, kind: input, shape index: {}]   ;;  %s234_s4 = inlined_call_operand.vmem [shape: f32[16,32], index: 4, kind: output, shape index: {}]  }
   0x1   :  { %v31_v0 = vld [vmem:[%s230_s1 + $0x18] sm:$0xff]  ;;  %v30_v1 = vld [vmem:[%s230_s1 + $0x10] sm:$0xff]  ;;  %23 = vst.msk [vmem:[#allocation2 + $0x8] sm:$0xff] %vm21_vm0, %v163_v2  ;;  %22 = vst.msk [vmem:[#allocation2] sm:$0xff] %vm21_vm0, %v163_v2 }
   0x2   :  { %151 = vmatprep.subr.mxu0 %v31_v0  ;;  %v26_v3 = vld [vmem:[%s231_s0] sm:$0xff]  ;;  %v29_v4 = vld [vmem:[%s230_s1 + $0x8] sm:$0xff] }
   0x3   :  { %152 = vmatpush3.msra.mxu0 %v31_v0  ;;  %159 = vmatprep.mubr.msk.f32.mxu0 %vm21_vm0, %v26_v3  ;;  %v28_v5 = vld [vmem:[%s230_s1] sm:$0xff]  ;;  %v27_v6 = vld [vmem:[%s231_s0 + $0x8] sm:$0xff] }
   0x4   :  { %153 = vmatprep.subr.mxu0 %v30_v1  ;;  %v144_v13 = vld [vmem:[%s232_s2] ss:$0 sm:$0xff]  ;;  %v133_v15 = vld [vmem:[%s233_s3 + $0x8] sm:$0xff] }
   0x5   :  { %154 = vmatpush3.msra.mxu0 %v30_v1  ;;  %v132_v18 = vld [vmem:[%s233_s3] sm:$0xff] }
   0x6   :  { %155 = vmatprep.subr.mxu0 %v29_v4 }
   0x7   :  { %156 = vmatpush3.msra.mxu0 %v29_v4 }
   0x8   :  { %157 = vmatprep.subr.mxu0 %v28_v5  ;;  %v25_v7 = vld [vmem:[#allocation2 + $0x8] sm:$0xff]  ;;  %v24_v9 = vld [vmem:[#allocation2] sm:$0xff] }
   0x9   :  { %158 = vmatpush3.msra.mxu0 %v28_v5 }
   0xa   :  { %160 = vmatmul.mubr.msk.f32.vlgmr.msra.gmra.mxu0 %vm21_vm0, %v27_v6 }
  0xca   :  { %v161_v8 = vpop.f32.mrf.mxu0 }
  0xcb   :  { %v115_v10 = vadd.f32 %v161_v8, %v25_v7 }
  0xcc   :  { %v105_v11 = vpop.f32.mrf.mxu0 }
  0xcd   :  { %117 = vst.msk [vmem:[#allocation2 + $0x8] sm:$0xff] %vm21_vm0, %v115_v10  ;;  %v114_v12 = vadd.f32 %v105_v11, %v24_v9 }
  0xcf   :  { %116 = vst.msk [vmem:[#allocation2] sm:$0xff] %vm21_vm0, %v114_v12 }
  0xd4   :  { %v122_v14 = vld [vmem:[#allocation2 + $0x8] sm:$0xff] }
  0xd5   :  { %v131_v16 = vadd.f32 %v144_v13, %v122_v14 }
  0xd6   :  { %v121_v17 = vld [vmem:[#allocation2] sm:$0xff] }
  0xd7   :  { %v135_v19 = vadd.f32 %v133_v15, %v131_v16  ;;  %v130_v20 = vadd.f32 %v144_v13, %v121_v17 }
  0xd9   :  { %137 = vst.msk [vmem:[%s234_s4 + $0x8] sm:$0xff] %vm21_vm0, %v135_v19  ;;  %v134_v21 = vadd.f32 %v132_v18, %v130_v20 }
  0xdb   :  { %136 = vst.msk [vmem:[%s234_s4] sm:$0xff] %vm21_vm0, %v134_v21 }

</bundles_post_ra>
